<compile_context>
chip_gen: v7x
topology: tpu7x:2x2x1
jax: 0.10.0
libtpu: 0.0.40
codegen_flags: <defaults>
</compile_context>

<pallas_src>
import functools

import jax
import jax.numpy as jnp
from jax.experimental import pallas as pl
from jax.experimental.pallas import tpu as pltpu

# Below v7x's 64 MiB physical VMEM (headroom for double-buffering), well above
# the 16/32 MiB default scoped limits on v5e/v6e.
_VMEM_LIMIT_BYTES = 48 * 1024 * 1024


def _round_up(x, m):
    return (x + m - 1) // m * m


# ---------------------------------------------------------------------------
# Kernel 1/3: generic tiled matmul + bias (used for input & vocab projections)
# ---------------------------------------------------------------------------
def _matmul_bias_kernel(x_ref, w_ref, b_ref, o_ref):
    o_ref[...] = (
        jnp.dot(x_ref[...], w_ref[...], preferred_element_type=jnp.float32)
        + b_ref[...]
    ).astype(o_ref.dtype)


def _matmul_bias(x, w, b, *, tm=256, tn=256, out_dtype=jnp.float32):
    """x:(M,K) bf16 @ w:(K,N) bf16 + b:(1,N) f32 -> (M,N) out_dtype.

    K and N must be multiples of 128 (callers pad); K stays untiled (it is the
    small embed / hidden dim).  tm/tn default to 256 to fill the 256-wide MXU
    on v6e/v7x (v5e runs these fine too); both are clamped to the padded
    problem so small shapes collapse to a single block.
    """
    M, K = x.shape
    _, N = w.shape
    if N % tn != 0:          # N is always a multiple of 128
        tn = 128
    Mp = _round_up(M, 8)
    tm = min(tm, Mp)
    Mp = _round_up(Mp, tm)
    if Mp != M:
        x = jnp.pad(x, ((0, Mp - M), (0, 0)))

    out = pl.pallas_call(
        _matmul_bias_kernel,
        out_shape=jax.ShapeDtypeStruct((Mp, N), out_dtype),
        grid_spec=pltpu.PrefetchScalarGridSpec(
            num_scalar_prefetch=0,
            grid=(Mp // tm, N // tn),
            in_specs=[
                pl.BlockSpec((tm, K), lambda i, j: (i, 0)),
                pl.BlockSpec((K, tn), lambda i, j: (0, j)),
                pl.BlockSpec((1, tn), lambda i, j: (0, j)),
            ],
            out_specs=pl.BlockSpec((tm, tn), lambda i, j: (i, j)),
        ),
        compiler_params=pltpu.CompilerParams(
            dimension_semantics=("parallel", "parallel"),
            vmem_limit_bytes=_VMEM_LIMIT_BYTES),
    )(x, w, b)
    return out[:M] if Mp != M else out


# ---------------------------------------------------------------------------
# Kernel 2/3: LSTM recurrence, batch-parallel grid x sequential time blocks
# ---------------------------------------------------------------------------
def _lstm_recurrent_kernel(gx_ref, whh_ref, h_out_ref, h_sc, c_sc, *, hp, tt):
    # h/c scratch persists across grid steps; time is the innermost axis, so
    # re-initialize whenever a new (parallel) batch block starts at t == 0.
    @pl.when(pl.program_id(1) == 0)
    def _():
        h_sc[...] = jnp.zeros_like(h_sc)
        c_sc[...] = jnp.zeros_like(c_sc)

    # Static full unroll over the small time block (tt is a Python int); keeps
    # the gx read and the batch-major h store fully static.
    # TODO(synk): at production B/H switch to lax.fori_loop with unroll=2-4 if
    # the bundle dump shows vreg spills with high ld/st slot utilization.
    for i in range(tt):
        # bf16 MXU operands, f32 accumulation; h/c state stays f32.
        gates = gx_ref[i].astype(jnp.float32) + jnp.dot(
            h_sc[...].astype(jnp.bfloat16), whh_ref[...],
            preferred_element_type=jnp.float32)
        # lane-aligned gate slices (hp multiple of 128), PyTorch order [i,f,g,o]
        i_g = jax.nn.sigmoid(gates[:, 0 * hp:1 * hp])
        f_g = jax.nn.sigmoid(gates[:, 1 * hp:2 * hp])
        g_g = jnp.tanh(gates[:, 2 * hp:3 * hp])
        o_g = jax.nn.sigmoid(gates[:, 3 * hp:4 * hp])
        c_new = f_g * c_sc[...] + i_g * g_g
        h_new = o_g * jnp.tanh(c_new)
        h_sc[...] = h_new
        c_sc[...] = c_new
        # Batch-major bf16 writeback: kills the XLA transpose before the vocab
        # projection (one sublane-partial store per timestep, cheap at tt=8).
        h_out_ref[:, i, :] = h_new.astype(h_out_ref.dtype)


def _lstm_recurrence(gx, whh, *, hp, tt, tb):
    """gx:(Tp,Bp,4Hp) bf16 gate pre-acts, whh:(Hp,4Hp) bf16
       -> h:(Bp,Tp,Hp) bf16 (batch-major)."""
    Tp, Bp, G = gx.shape
    kernel = functools.partial(_lstm_recurrent_kernel, hp=hp, tt=tt)
    return pl.pallas_call(
        kernel,
        out_shape=jax.ShapeDtypeStruct((Bp, Tp, hp), jnp.bfloat16),
        grid_spec=pltpu.PrefetchScalarGridSpec(
            num_scalar_prefetch=0,
            # batch axis parallel (independent recurrences -> megacore / 2 TCs
            # on v7x), time axis sequential (carries h/c scratch).
            grid=(Bp // tb, Tp // tt),
            in_specs=[
                pl.BlockSpec((tt, tb, G), lambda b, t: (t, b, 0)),
                pl.BlockSpec((hp, G), lambda b, t: (0, 0)),
            ],
            out_specs=pl.BlockSpec((tb, tt, hp), lambda b, t: (b, t, 0)),
            scratch_shapes=[
                pltpu.VMEM((tb, hp), jnp.float32),  # h state
                pltpu.VMEM((tb, hp), jnp.float32),  # c state
            ],
        ),
        compiler_params=pltpu.CompilerParams(
            dimension_semantics=("parallel", "arbitrary"),
            vmem_limit_bytes=_VMEM_LIMIT_BYTES),
    )(gx, whh)


# ---------------------------------------------------------------------------
# Wrapper: DecoderRNN.forward
# ---------------------------------------------------------------------------
def decoder_rnn_forward(params, features, captions, *, time_block=8,
                        batch_block=128):
    """features: (B, E) f32, captions: (B, Tc) int32 -> logits (B, Tc, V)."""
    emb_table = params["embed"]          # (V, E)
    w_ih = params["w_ih"]                # (4H, E)
    w_hh = params["w_hh"]                # (4H, H)
    b_ih = params["b_ih"]                # (4H,)
    b_hh = params["b_hh"]                # (4H,)
    w_lin = params["w_lin"]              # (V, H)
    b_lin = params["b_lin"]              # (V,)

    B, E = features.shape
    H = w_hh.shape[1]
    V = w_lin.shape[0]
    T = captions.shape[1]                # 1 feature step + (Tc-1) token steps

    Tt = _round_up(time_block, 8)
    Tp = _round_up(T, Tt)
    Tb = min(batch_block, _round_up(B, 8))      # batch tile (multiple of 8)
    Bp = _round_up(B, Tb)
    Ep = _round_up(E, 128)
    Hp = _round_up(H, 128)
    Vp = _round_up(V, 128)

    # --- glue: embedding lookup, time-major, built directly in bf16 ---------
    emb = emb_table.astype(jnp.bfloat16)[captions[:, :-1].T]         # (T-1,B,E)
    x_tm = jnp.concatenate(
        [features[None, :, :].astype(jnp.bfloat16), emb], axis=0)    # (T,B,E)
    x_tm = jnp.pad(x_tm, ((0, Tp - T), (0, Bp - B), (0, Ep - E)))    # (Tp,Bp,Ep)

    # --- weight prep: pad each gate block of H to Hp; lane-dense layouts ----
    def pad_gate_rows(w):  # (4H, X) -> (4*Hp, X), each gate's rows zero-padded
        X = w.shape[1]
        w4 = w.reshape(4, H, X)
        w4 = jnp.pad(w4, ((0, 0), (0, Hp - H), (0, 0)))
        return w4.reshape(4 * Hp, X)

    wih_p = jnp.pad(pad_gate_rows(w_ih), ((0, 0), (0, Ep - E)))      # (4Hp, Ep)
    wih_t = jnp.transpose(wih_p).astype(jnp.bfloat16)                # (Ep, 4Hp)

    whh_p = jnp.pad(pad_gate_rows(w_hh), ((0, 0), (0, Hp - H)))      # (4Hp, Hp)
    whh_t = jnp.transpose(whh_p).astype(jnp.bfloat16)                # (Hp, 4Hp)

    bias = (b_ih + b_hh).reshape(4, H)
    bias = jnp.pad(bias, ((0, 0), (0, Hp - H))).reshape(1, 4 * Hp)
    bias = bias.astype(jnp.float32)                                  # (1, 4Hp)

    wlin_p = jnp.pad(w_lin, ((0, Vp - V), (0, Hp - H)))              # (Vp, Hp)
    wlin_t = jnp.transpose(wlin_p).astype(jnp.bfloat16)              # (Hp, Vp)
    blin = jnp.pad(b_lin, (0, Vp - V)).reshape(1, Vp).astype(jnp.float32)

    # 1) input projection for all T*B tokens at once -> bf16 gate pre-acts
    gx = _matmul_bias(x_tm.reshape(Tp * Bp, Ep), wih_t, bias,
                      out_dtype=jnp.bfloat16)
    gx = gx.reshape(Tp, Bp, 4 * Hp)                                  # bf16

    # 2) LSTM recurrence (h/c carried in f32 VMEM scratch, bf16 MXU operands),
    #    hidden states written batch-major in bf16.
    h_all = _lstm_recurrence(gx, whh_t, hp=Hp, tt=Tt, tb=Tb)         # (Bp,Tp,Hp)

    # 3) vocab projection; keep the hidden activations fully resident when
    #    small so W_lin streams from HBM exactly once (tile only Vp).
    h2d = h_all[:, :T, :].reshape(Bp * T, Hp)                        # bf16
    m_rows = _round_up(Bp * T, 8)
    tm_vocab = m_rows if m_rows * Hp * 2 <= (2 << 20) else 512
    logits = _matmul_bias(h2d, wlin_t, blin, tm=tm_vocab, tn=256)
    logits = logits.reshape(Bp, T, Vp)

    return logits[:B, :, :V]                                         # (B, T, V)


# ---------------------------------------------------------------------------
# Pure-JAX reference matching torch semantics (for correctness check)
# ---------------------------------------------------------------------------
def _reference_forward(params, features, captions):
    emb_table = params["embed"]
    w_ih, w_hh = params["w_ih"], params["w_hh"]
    b = params["b_ih"] + params["b_hh"]
    w_lin, b_lin = params["w_lin"], params["b_lin"]
    H = w_hh.shape[1]

    embeddings = emb_table[captions[:, :-1]]
    inputs = jnp.concatenate([features[:, None, :], embeddings], axis=1)
    B = inputs.shape[0]

    def step(carry, x_t):
        h, c = carry
        gates = x_t @ w_ih.T + h @ w_hh.T + b
        i = jax.nn.sigmoid(gates[:, 0 * H:1 * H])
        f = jax.nn.sigmoid(gates[:, 1 * H:2 * H])
        g = jnp.tanh(gates[:, 2 * H:3 * H])
        o = jax.nn.sigmoid(gates[:, 3 * H:4 * H])
        c = f * c + i * g
        h = o * jnp.tanh(c)
        return (h, c), h

    h0 = jnp.zeros((B, H), jnp.float32)
    c0 = jnp.zeros((B, H), jnp.float32)
    _, hiddens = jax.lax.scan(step, (h0, c0), jnp.transpose(inputs, (1, 0, 2)))
    hiddens = jnp.transpose(hiddens, (1, 0, 2))
    return hiddens @ w_lin.T + b_lin


if __name__ == "__main__":
    batch = 2
    embed_size = 32
    hidden_size = 32
    vocab_size = 64
    caption_len = 8  # captions (B, 8) -> sequence length 8 (1 feature + 7 embeds)

    key = jax.random.PRNGKey(0)
    ks = jax.random.split(key, 9)
    scale = 0.1
    params = {
        "embed": scale * jax.random.normal(ks[0], (vocab_size, embed_size), jnp.float32),
        "w_ih": scale * jax.random.normal(ks[1], (4 * hidden_size, embed_size), jnp.float32),
        "w_hh": scale * jax.random.normal(ks[2], (4 * hidden_size, hidden_size), jnp.float32),
        "b_ih": scale * jax.random.normal(ks[3], (4 * hidden_size,), jnp.float32),
        "b_hh": scale * jax.random.normal(ks[4], (4 * hidden_size,), jnp.float32),
        "w_lin": scale * jax.random.normal(ks[5], (vocab_size, hidden_size), jnp.float32),
        "b_lin": scale * jax.random.normal(ks[6], (vocab_size,), jnp.float32),
    }

    features = jax.random.normal(ks[7], (batch, embed_size), jnp.float32)
    captions = jax.random.randint(ks[8], (batch, caption_len), 0, vocab_size, jnp.int32)

    out = decoder_rnn_forward(params, features, captions)
    out = jax.block_until_ready(out)

    ref = _reference_forward(params, features, captions)
    assert out.shape == (batch, caption_len, vocab_size), out.shape
    max_err = float(jnp.max(jnp.abs(out - ref)))
    # bf16 matmul operands / gx / h with f32 accumulation & f32 h/c state
    assert jnp.allclose(out, ref, atol=2e-2, rtol=2e-2), f"mismatch, max_err={max_err}"

    print("KERNEL_OK")
</pallas_src>

<mosaic_0001>
module attributes {stable_mosaic.version = 11 : i64} {
  func.func @_matmul_bias_kernel(%arg0: i32, %arg1: i32, %arg2: memref<64x128xbf16, #tpu.memory_space<vmem>>, %arg3: memref<128x256xbf16, #tpu.memory_space<vmem>>, %arg4: memref<1x256xf32, #tpu.memory_space<vmem>>, %arg5: memref<64x256xbf16, #tpu.memory_space<vmem>>) attributes {dimension_semantics = [#tpu.dimension_semantics<parallel>, #tpu.dimension_semantics<parallel>], iteration_bounds = array<i64: 1, 2>, scalar_prefetch = 0 : i64, scratch_operands = 0 : i64, tpu.core_type = #tpu.core_type<tc>, window_params = [{transform_indices = @transform_0, window_bounds = array<i64: 64, 128>}, {transform_indices = @transform_1, window_bounds = array<i64: 128, 256>}, {transform_indices = @transform_2, window_bounds = array<i64: 1, 256>}, {transform_indices = @transform_3, window_bounds = array<i64: 64, 256>}]} {
    %c0 = arith.constant 0 : index
    %c0_0 = arith.constant 0 : index
    %0 = vector.load %arg2[%c0, %c0_0] : memref<64x128xbf16, #tpu.memory_space<vmem>>, vector<64x128xbf16>
    %c0_1 = arith.constant 0 : index
    %c0_2 = arith.constant 0 : index
    %1 = vector.load %arg3[%c0_1, %c0_2] : memref<128x256xbf16, #tpu.memory_space<vmem>>, vector<128x256xbf16>
    %cst = arith.constant dense<0.000000e+00> : vector<64x256xf32>
    %2 = tpu.matmul %0, %1, %cst {dimension_numbers = #tpu.dot_dimension_numbers<[1], [0], [0], [1], [0, 0, 1, 1], [], []>} : vector<64x128xbf16>, vector<128x256xbf16>, vector<64x256xf32> -> vector<64x256xf32>
    %c0_3 = arith.constant 0 : index
    %c0_4 = arith.constant 0 : index
    %3 = vector.load %arg4[%c0_3, %c0_4] : memref<1x256xf32, #tpu.memory_space<vmem>>, vector<1x256xf32>
    %4 = vector.broadcast %3 : vector<1x256xf32> to vector<64x256xf32>
    %5 = arith.addf %2, %4 : vector<64x256xf32>
    %6 = arith.truncf %5 : vector<64x256xf32> to vector<64x256xbf16>
    %c0_5 = arith.constant 0 : index
    %c0_6 = arith.constant 0 : index
    %7 = vector.load %arg5[%c0_5, %c0_6] : memref<64x256xbf16, #tpu.memory_space<vmem>>, vector<64x256xbf16>
    tpu.vector_store %arg5[%c0_5, %c0_6], %6 {strides = array<i32>} : memref<64x256xbf16, #tpu.memory_space<vmem>>, vector<64x256xbf16>,
    return
  }
  func.func @transform_0(%arg0: i32, %arg1: i32) -> (i32, i32) {
    %c0_i32 = arith.constant 0 : i32
    %c0_i32_0 = arith.constant 0 : i32
    return %arg0, %c0_i32 : i32, i32
  }
  func.func @transform_1(%arg0: i32, %arg1: i32) -> (i32, i32) {
    %c0_i32 = arith.constant 0 : i32
    %c0_i32_0 = arith.constant 0 : i32
    return %c0_i32, %arg1 : i32, i32
  }
  func.func @transform_2(%arg0: i32, %arg1: i32) -> (i32, i32) {
    %c0_i32 = arith.constant 0 : i32
    %c0_i32_0 = arith.constant 0 : i32
    return %c0_i32, %arg1 : i32, i32
  }
  func.func @transform_3(%arg0: i32, %arg1: i32) -> (i32, i32) {
    %c0_i32 = arith.constant 0 : i32
    return %arg0, %arg1 : i32, i32
  }
}

</mosaic_0001>

<bundles_post_ra>
// kernel: tpu_custom_call.1
= control target key start
LH: loop header
LB: loop body
LE: loop exit
PB: predicated region body
PF: predicated region fallthrough
CT: control target
= control target key end

     0   :  { %8 = vsyncpa [#allocation3], 0  ;;  %s1257_s0 = inlined_call_operand.hbm [shape: bf16[64,128], index: 0, kind: input, shape index: {}]   ;;  %s1258_s1 = inlined_call_operand.hbm [shape: bf16[128,512], index: 1, kind: input, shape index: {}]   ;;  %s1259_s2 = inlined_call_operand.vmem [shape: f32[1,512], index: 2, kind: input, shape index: {}]   ;;  %s1260_s3 = inlined_call_operand.hbm [shape: bf16[64,512], index: 3, kind: output, shape index: {}]  }
   0x1   :  { %9 = vsyncpa [#allocation6], 0 }
   0x2   :  { %11 = vsyncpa [#allocation6 + $0x1], 0 }
   0x3   :  { %12 = vsyncpa [#allocation4], 0 }
   0x4   :  { %14 = vsyncpa [#allocation4 + $0x1], 0  ;;  %s1003_s12 = smov 0   ;;  %s1005_s13 = smov 0  }
   0x5   :  { %s1007_s14 = smov 0   ;;  %s1009_s15 = smov 0  }
   0x6   :  { %s1011_s16 = smov 0   ;;  %s1013_s17 = smov 0  }
   0x7 LB: > { %s643_s18 = sadd.s32 4294967295, %s969_s17   ;;  %s644_s19 = sadd.s32 4294967294, %s969_s17   ;;  %s969_s17 = sphi %s1013_s17, %s20_s17   ;;  %s965_s16 = sphi %s1011_s16, %s1286_s16   ;;  %s961_s15 = sphi %s1009_s15, %s1285_s15   ;;  %s957_s14 = sphi %s1007_s14, %s1284_s14   ;;  %s953_s13 = sphi %s1005_s13, %s1283_s13   ;;  %s949_s12 = sphi %s1003_s12, %s1282_s12  }
   0x8   : > { %p72_p0 = scmp.ne.s32.totalorder %s957_s14, %s953_s13  ;;  %p73_p1 = scmp.eq.s32.totalorder %s969_s17, 0 }
   0x9   : > { %p78_p2 = scmp.ne.s32.totalorder %s953_s13, %s949_s12  ;;  %p1040_p3 = scmp.eq.s32.totalorder %s643_s18, 0 }
   0xa   : > { %p1044_p4 = por %p73_p1, %p72_p0  ;;  %p130_p5 = scmp.eq.s32.totalorder %s643_s18, 1 }
   0xb   : > { %s1267_s20 = scalar_select %p1040_p3, 1, 0 }
   0xc   : > { %p1050_p6 = por %p1040_p3, %p78_p2  ;;  %p136_p7 = scmp.eq.s32.totalorder %s644_s19, 1 }
   0xd   : > { %p1054_p8 = por %p130_p5, %p72_p0  ;;  %p645_p9 = scmp.ge.s32.totalorder %s969_s17, 1 }
   0xe   : > { %s1269_s22 = scalar_select %p1050_p6, 1, 0 }
   0xf   : > { %s1270_s23 = scalar_select %p1054_p8, 1, 0 }
  0x10   : > { %p1059_p10 = por %p136_p7, %p78_p2  ;;  %p143_p11 = scmp.lt.s32.totalorder %s969_s17, 3 }
  0x11   : > { %s971_s26 = smov [#allocation2]   ;;  %p736_p1 = scmp.lt.s32.totalorder %s969_s17, 2 }
  0x12   : > { %s1271_s24 = scalar_select %p1059_p10, 1, 0 }
  0x13   : > { %p1064_p12 = pnand %p645_p9, %p143_p11  ;;  %s158_s27 = sshll.u32 %s971_s26, 4  ;;  %s1068_s27 = int_to_ptr.vmem [resolvable:$true] %s158_s27 }
  0x14   : > { %p1082_p2 = pnand %p736_p1, %p1044_p4  ;;  %s29_s30 = sadd.s32 1, %s965_s16 }
  0x15   : > { %s1272_s25 = scalar_select %p1064_p12, 1, 0 }
  0x16   : > { %p723_p13 = pneg %p1064_p12  ;;  %s825_s6 = scalar_lea.hbm %s1257_s0, 512 }
  0x17   : > { %s1274_s29 = scalar_select %p1082_p2, 1, 0 }
  0x18   : > { %p1076_p5 = pnand %p723_p13, %p1040_p3  ;;  %p826_p7 = scmp.ne.s32.totalorder %s1257_s0, %s825_s6 }
  0x19   : > { %p832_p4 = scmp.lt.u32.totalorder %s825_s6, %s1257_s0 }
  0x1a   : > { %p827_p9 = pneg %p1076_p5 }
  0x1c   : > { %p828_p11 = pnand %p827_p9, %p826_p7 }
  0x1e   : > { %p829_p13 = pneg %p828_p11 }
  0x20   : > { %p834_p1 = pnand %p832_p4, %p829_p13 }
  0x22   : > { %837 = shalt.err (!%p834_p1)
}
  0x23   : > { %s838_s11 = scalar_lea.vmem %s1068_s27, 512  ;;  %p846_p6 = scmp.lt.s32.totalorder %s1068_s27, %s1068_s27 }
  0x24   : > { %p839_p0 = scmp.ne.s32.totalorder %s1068_s27, %s838_s11  ;;  %p847_p3 = scmp.lt.s32.totalorder %s838_s11, %s838_s11 }
  0x26   : > { %p841_p10 = pnand %p839_p0, %p827_p9  ;;  %p848_p12 = por %p847_p3, %p846_p6 }
  0x28   : > { %p842_p8 = pneg %p841_p10 }
  0x2a   : > { %p849_p2 = pnand %p848_p12, %p842_p8 }
  0x2c   : > { %852 = shalt.err (!%p849_p2)
}
  0x2d   : > { %s972_s18 = smov 64   ;;  %s973_s19 = smov 4  }
  0x2e   : > { %726 = dma.hbm_to_vmem [thread:$0]  (!%p1076_p5), %s1257_s0, 512, %s1068_s27, [#allocation3], %s972_s18, %s972_s18, %s973_s19  }
  0x2f   : > { %p30_p10 = scmp.ge.s32.totalorder %s29_s30, 2  ;;  %s65_s4 = sadd.s32 1, %s957_s14 }
  0x30   : > { %s172_s5 = sand.u32 1, %s957_s14   ;;  %s689_s8 = sshll.u32 %s965_s16, 7 }
  0x31   : > { %s1288_s30 = smov (%p30_p10, %s29_s30), 0  ;;  %s648_s6 = sshll.u32 %s172_s5, 7 }
  0x32   : > { %s62_s7 = ssub.s32 %s965_s16, %s1288_s30  ;;  %s1118_s28 = scalar_lea.hbm %s1258_s1, %s689_s8 }
  0x33   : > { %p63_p3 = scmp.eq.s32.totalorder %s62_s7, 0  ;;  %s176_s27 = scalar_lea.vmem [#allocation5], %s648_s6 }
  0x34   : > { %s183_s11 = sshll.u32 %s176_s27, 4  ;;  %s1125_s19 = scalar_lea.sflag [#allocation6], %s172_s5  ;;  %s1123_s11 = int_to_ptr.vmem [resolvable:$true] %s183_s11 }
  0x35   : > { %s1121_s18 = scalar_select %p63_p3, %s957_s14, %s65_s4  }
  0x36   : > { %s853_s21 = scalar_lea.hbm %s1118_s28, 2048  ;;  %p1275_p8 = scmp.ne.s32.totalorder %s1274_s29, 0 }
  0x37   : > { %p854_p6 = scmp.ne.s32.totalorder %s1118_s28, %s853_s21  ;;  %s858_s8 = scalar_lea.hbm %s1258_s1, 4096 }
  0x38   : > { %p855_p12 = pneg %p1275_p8  ;;  %p859_p2 = scmp.lt.u32.totalorder %s1118_s28, %s1258_s1 }
  0x39   : > { %p860_p7 = scmp.lt.u32.totalorder %s858_s8, %s853_s21  ;;  %p862_p11 = scmp.lt.u32.totalorder %s853_s21, %s1118_s28 }
  0x3a   : > { %p856_p0 = pnand %p855_p12, %p854_p6 }
  0x3b   : > { %p861_p9 = por %p860_p7, %p859_p2 }
  0x3c   : > { %p857_p5 = pneg %p856_p0 }
  0x3d   : > { %p863_p13 = por %p862_p11, %p861_p9 }
  0x3f   : > { %p864_p4 = pnand %p863_p13, %p857_p5 }
  0x41   : > { %867 = shalt.err (!%p864_p4)
}
  0x42   : > { %s868_s4 = scalar_lea.vmem %s1123_s11, 2048  ;;  %s974_s5 = smov [#allocation5]  }
  0x43   : > { %p869_p1 = scmp.ne.s32.totalorder %s1123_s11, %s868_s4  ;;  %s873_s10 = sshll.u32 %s974_s5, 4  ;;  %s874_s10 = int_to_ptr.vmem [resolvable:$false] %s873_s10 }
  0x44   : > { %s875_s27 = scalar_lea.vmem %s874_s10, 4096  ;;  %p876_p6 = scmp.lt.s32.totalorder %s1123_s11, %s874_s10 }
  0x45   : > { %p871_p10 = pnand %p869_p1, %p855_p12  ;;  %p877_p0 = scmp.lt.s32.totalorder %s875_s27, %s868_s4 }
  0x47   : > { %p872_p3 = pneg %p871_p10  ;;  %p878_p2 = por %p877_p0, %p876_p6 }
  0x49   : > { %p879_p7 = pnand %p878_p2, %p872_p3 }
  0x4b   : > { %882 = shalt.err (!%p879_p7)
}
  0x4c   : > { %s975_s21 = smov 256   ;;  %s976_s26 = smov 128  }
  0x4d   : > { %s977_s7 = smov 8   ;;  %p1276_p12 = scmp.ne.s32.totalorder %s1272_s25, 0 }
  0x4e   : > { %730 = dma.hbm_to_vmem [thread:$0]  (!%p1275_p8), %s1118_s28, 2048, %s1123_s11, %s1125_s19, %s975_s21, %s976_s26, %s977_s7  }
  0x4f   : > { %203 = sbr.rel (%p1276_p12) target bundleno = 368 (0x170), region = 32  ;;  %p1277_p5 = scmp.ne.s32.totalorder (!%p1276_p12), %s1267_s20, 0 }
  0x56   : > { %936 = dma.done.wait (%p1277_p5), [#allocation3], 512  }
  0x57   : > { %938 = vsyncadd (%p1277_p5), [#allocation3], 4294966784  ;;  %s1160_s8 = sand.u32 1, %s953_s13   ;;  %p1278_p8 = scmp.ne.s32.totalorder %s1269_s22, 0 }
  0x58   : > { %s653_s6 = sshll.u32 %s1160_s8, 7  ;;  %s210_s9 = scalar_lea.sflag [#allocation6], %s1160_s8 }
  0x59   : > { %s1164_s4 = scalar_lea.vmem [#allocation5], %s653_s6 }
  0x5a   : > { %940 = dma.done.wait (%p1278_p8), %s210_s9, 2048  }
  0x5b   : > { %942 = vsyncadd (%p1278_p8), %s210_s9, 4294965248  ;;  %v978_v0 = vmov 0   ;;  %v797_v1 = vld [vmem:[%s1164_s4 + $0x4] ss:$8 sps:$4 sm:$0xff]   ;;  %v799_v2 = vld [vmem:[%s1164_s4] ss:$8 sps:$4 sm:$0xff]   ;;  %v276_v21 = vlaneseq }
  0x5c   : > { %422 = vmatprep.mubr.bf16.mxu0 %v978_v0  ;;  %442 = vmatprep.mubr.bf16.mxu1 %v978_v0  ;;  %v800_v3 = vld [vmem:[%s1164_s4 + $0x14] ss:$8 sps:$4 sm:$0xff]   ;;  %v802_v4 = vld [vmem:[%s1164_s4 + $0x10] ss:$8 sps:$4 sm:$0xff]   ;;  %v803_v5 = vld [vmem:[%s1164_s4 + $0x24] ss:$8 sps:$4 sm:$0xff]  }
  0x5d   : > { %390 = vmatprep.subr.bf16.mxu0 %v797_v1  ;;  %699 = vmatprep.subr.bf16.mxu1 %v797_v1  ;;  %v805_v6 = vld [vmem:[%s1164_s4 + $0x20] ss:$8 sps:$4 sm:$0xff]   ;;  %v806_v7 = vld [vmem:[%s1164_s4 + $0x34] ss:$8 sps:$4 sm:$0xff]   ;;  %v808_v8 = vld [vmem:[%s1164_s4 + $0x30] ss:$8 sps:$4 sm:$0xff]  }
  0x5e   : > { %391 = vmatpush1.bf16.msra.mxu0 %v799_v2  ;;  %707 = vmatpush1.bf16.msra.mxu1 %v799_v2  ;;  %v809_v9 = vld [vmem:[%s1164_s4 + $0x44] ss:$8 sps:$4 sm:$0xff]   ;;  %v811_v10 = vld [vmem:[%s1164_s4 + $0x40] ss:$8 sps:$4 sm:$0xff]   ;;  %v812_v11 = vld [vmem:[%s1164_s4 + $0x54] ss:$8 sps:$4 sm:$0xff]  }
  0x5f   : > { %392 = vmatprep.subr.bf16.mxu0 %v800_v3  ;;  %700 = vmatprep.subr.bf16.mxu1 %v800_v3  ;;  %v814_v12 = vld [vmem:[%s1164_s4 + $0x50] ss:$8 sps:$4 sm:$0xff]   ;;  %v815_v13 = vld [vmem:[%s1164_s4 + $0x64] ss:$8 sps:$4 sm:$0xff]   ;;  %v817_v14 = vld [vmem:[%s1164_s4 + $0x60] ss:$8 sps:$4 sm:$0xff]  }
  0x60   : > { %v818_v15 = vld [vmem:[%s1164_s4 + $0x74] ss:$8 sps:$4 sm:$0xff]   ;;  %v820_v16 = vld [vmem:[%s1164_s4 + $0x70] ss:$8 sps:$4 sm:$0xff]   ;;  %v821_v17 = vld [vmem:[#allocation2] sm:$0xff]   ;;  %s655_s20 = sshll.u32 %s961_s15, 1 }
  0x61   : > { %v822_v18 = vld [vmem:[#allocation2 + $0x10] sm:$0xff]   ;;  %v823_v19 = vld [vmem:[#allocation2 + $0x8] sm:$0xff]   ;;  %v824_v20 = vld [vmem:[#allocation2 + $0x18] sm:$0xff]   ;;  %p243_p9 = scmp.lt.s32.totalorder %s655_s20, 3  ;;  %v277_v22 = vshrl.u32 %v276_v21, 7  ;;  %s654_s28 = sshll.u32 %s1160_s8, 6 }
  0x62   : > { %393 = vmatpush1.bf16.msra.mxu0 %v802_v4  ;;  %708 = vmatpush1.bf16.msra.mxu1 %v802_v4  ;;  %s1191_s11 = scalar_lea.vmem [#allocation7], %s654_s28  ;;  %s698_s5 = sshll.u32 %s961_s15, 7 }
  0x63   : > { %394 = vmatprep.subr.bf16.mxu0 %v803_v5  ;;  %701 = vmatprep.subr.bf16.mxu1 %v803_v5  ;;  %s1290_s20 = smov (!%p243_p9, %s655_s20), 3  ;;  %v278_v23 = vsub.s32 0, %v277_v22  ;;  %v282_v25 = vsub.s32 1, %v277_v22  ;;  %s536_s19 = sshll.u32 %s1191_s11, 4  ;;  %s1199_s19 = int_to_ptr.vmem [resolvable:$true] %s536_s19 }
  0x64   : > { %s245_s29 = scalar_lea.vmem %s1259_s2, %s1290_s20  ;;  %s1204_s21 = scalar_lea.hbm %s1260_s3, %s698_s5 }
  0x65   : > { %v274_v24 = vld [vmem:[%s245_s29] sm:$0x3]  ;;  %s520_s15 = scalar_lea.sflag [#allocation4], %s1160_s8  ;;  %s883_s26 = scalar_lea.vmem %s1199_s19, 1024 }
  0x66   : > { %395 = vmatpush1.bf16.msra.mxu0 %v805_v6  ;;  %709 = vmatpush1.bf16.msra.mxu1 %v805_v6  ;;  %v279_v26 = vrot.slane %v274_v24, %v278_v23  ;;  %v283_v27 = vrot.slane %v274_v24, %v282_v25  ;;  %p884_p11 = scmp.ne.s32.totalorder %s1199_s19, %s883_s26  ;;  %p1279_p13 = scmp.ne.s32.totalorder %s1270_s23, 0 }
  0x67   : > { %396 = vmatprep.subr.bf16.mxu0 %v806_v7  ;;  %702 = vmatprep.subr.bf16.mxu1 %v806_v7  ;;  %s979_s7 = smov [#allocation7]  }
  0x68   : > { %p885_p4 = pnand %p884_p11, %p1279_p13  ;;  %s887_s6 = sshll.u32 %s979_s7, 4  ;;  %s888_s6 = int_to_ptr.vmem [resolvable:$false] %s887_s6 }
  0x69   : > { %s889_s9 = scalar_lea.vmem %s888_s6, 2048  ;;  %p890_p10 = scmp.lt.s32.totalorder %s1199_s19, %s888_s6 }
  0x6a   : > { %397 = vmatpush1.bf16.msra.mxu0 %v808_v8  ;;  %710 = vmatpush1.bf16.msra.mxu1 %v808_v8  ;;  %p886_p1 = pneg %p885_p4  ;;  %p891_p3 = scmp.lt.s32.totalorder %s889_s9, %s883_s26 }
  0x6b   : > { %398 = vmatprep.subr.bf16.mxu0 %v809_v9  ;;  %703 = vmatprep.subr.bf16.mxu1 %v809_v9 }
  0x6c   : > { %p892_p6 = por %p891_p3, %p890_p10 }
  0x6e   : > { %399 = vmatpush1.bf16.msra.mxu0 %v811_v10  ;;  %711 = vmatpush1.bf16.msra.mxu1 %v811_v10  ;;  %p893_p0 = pnand %p892_p6, %p886_p1 }
  0x6f   : > { %400 = vmatprep.subr.bf16.mxu0 %v812_v11  ;;  %704 = vmatprep.subr.bf16.mxu1 %v812_v11 }
  0x72   : > { %401 = vmatpush1.bf16.msra.mxu0 %v814_v12  ;;  %712 = vmatpush1.bf16.msra.mxu1 %v814_v12 }
  0x73   : > { %402 = vmatprep.subr.bf16.mxu0 %v815_v13  ;;  %705 = vmatprep.subr.bf16.mxu1 %v815_v13 }
  0x76   : > { %403 = vmatpush1.bf16.msra.mxu0 %v817_v14  ;;  %713 = vmatpush1.bf16.msra.mxu1 %v817_v14 }
  0x77   : > { %404 = vmatprep.subr.bf16.mxu0 %v818_v15  ;;  %706 = vmatprep.subr.bf16.mxu1 %v818_v15 }
  0x7a   : > { %405 = vmatpush1.bf16.msra.mxu0 %v820_v16  ;;  %714 = vmatpush1.bf16.msra.mxu1 %v820_v16 }
  0x7d   : > { %423 = vmatmul.mubr.bf16.vlgmr.msra.gmra.mrb[0].mxu0 %v821_v17  ;;  %443 = vmatmul.mubr.bf16.vlgmr.msra.gmra.mrb[0].mxu1 %v822_v18 }
  0x7e   : > { %432 = vmatprep.mubr.bf16.mxu0 %v978_v0  ;;  %452 = vmatprep.mubr.bf16.mxu1 %v978_v0 }
  0x85   : > { %433 = vmatmul.mubr.bf16.gmra.mrb[4].mxu0 %v823_v19  ;;  %453 = vmatmul.mubr.bf16.gmra.mrb[4].mxu1 %v824_v20 }
 0x150   : > { %v424_v28 = vpop.f32.mrb[0].mxu0  ;;  %v444_v29 = vpop.f32.mrb[0].mxu1 }
 0x151   : > { %v425_v30 = vadd.f32 %v424_v28, %v279_v26  ;;  %v445_v31 = vadd.f32 %v444_v29, %v279_v26  ;;  %v426_v32 = vpop.f32.mrb[1].mxu0  ;;  %v446_v33 = vpop.f32.mrb[1].mxu1 }
 0x152   : > { %v427_v34 = vadd.f32 %v426_v32, %v283_v27  ;;  %v447_v35 = vadd.f32 %v446_v33, %v283_v27  ;;  %v428_v36 = vpop.f32.mrb[2].mxu0  ;;  %v448_v37 = vpop.f32.mrb[2].mxu1 }
 0x153   : > { %v429_v38 = vadd.f32 %v428_v36, %v279_v26  ;;  %v449_v39 = vadd.f32 %v448_v37, %v279_v26  ;;  %v430_v40 = vpop.f32.mrb[3].mxu0  ;;  %v450_v41 = vpop.f32.mrb[3].mxu1 }
 0x154   : > { %v690_v42 = vpack.c.bf16 %v427_v34, %v425_v30  ;;  %v694_v43 = vpack.c.bf16 %v447_v35, %v445_v31  ;;  %v431_v44 = vadd.f32 %v430_v40, %v283_v27  ;;  %v451_v45 = vadd.f32 %v450_v41, %v283_v27 }
 0x156   : > { %511 = vst [vmem:[%s1191_s11] sm:$0xff] %v690_v42  ;;  %515 = vst [vmem:[%s1191_s11 + $0x20] sm:$0xff] %v694_v43  ;;  %v691_v46 = vpack.c.bf16 %v431_v44, %v429_v38  ;;  %v695_v47 = vpack.c.bf16 %v451_v45, %v449_v39 }
 0x158   : > { %512 = vst [vmem:[%s1191_s11 + $0x8] sm:$0xff] %v691_v46  ;;  %516 = vst [vmem:[%s1191_s11 + $0x28] sm:$0xff] %v695_v47  ;;  %v434_v48 = vpop.f32.mrb[4].mxu0  ;;  %v454_v49 = vpop.f32.mrb[4].mxu1 }
 0x159   : > { %v435_v50 = vadd.f32 %v434_v48, %v279_v26  ;;  %v455_v51 = vadd.f32 %v454_v49, %v279_v26  ;;  %v436_v52 = vpop.f32.mrb[5].mxu0  ;;  %v456_v53 = vpop.f32.mrb[5].mxu1 }
 0x15a   : > { %v437_v54 = vadd.f32 %v436_v52, %v283_v27  ;;  %v457_v55 = vadd.f32 %v456_v53, %v283_v27  ;;  %v438_v56 = vpop.f32.mrb[6].mxu0  ;;  %v458_v57 = vpop.f32.mrb[6].mxu1 }
 0x15b   : > { %v439_v58 = vadd.f32 %v438_v56, %v279_v26  ;;  %v459_v59 = vadd.f32 %v458_v57, %v279_v26  ;;  %v440_v60 = vpop.f32.mrb[7].mxu0  ;;  %v460_v61 = vpop.f32.mrb[7].mxu1 }
 0x15c   : > { %v692_v62 = vpack.c.bf16 %v437_v54, %v435_v50  ;;  %v696_v63 = vpack.c.bf16 %v457_v55, %v455_v51  ;;  %v441_v0 = vadd.f32 %v440_v60, %v283_v27  ;;  %v461_v1 = vadd.f32 %v460_v61, %v283_v27 }
 0x15e   : > { %513 = vst [vmem:[%s1191_s11 + $0x10] sm:$0xff] %v692_v62  ;;  %517 = vst [vmem:[%s1191_s11 + $0x30] sm:$0xff] %v696_v63  ;;  %v693_v2 = vpack.c.bf16 %v441_v0, %v439_v58  ;;  %v697_v3 = vpack.c.bf16 %v461_v1, %v459_v59 }
 0x160   : > { %514 = vst [vmem:[%s1191_s11 + $0x18] sm:$0xff] %v693_v2  ;;  %518 = vst [vmem:[%s1191_s11 + $0x38] sm:$0xff] %v697_v3 }
 0x161   : > { %896 = shalt.err (!%p893_p0)
}
 0x162   : > { %s897_s4 = scalar_lea.hbm %s1204_s21, 1024  ;;  %s901_s25 = scalar_lea.hbm %s1260_s3, 2048 }
 0x163   : > { %p898_p2 = scmp.ne.s32.totalorder %s1204_s21, %s897_s4  ;;  %p902_p5 = scmp.lt.u32.totalorder %s1204_s21, %s1260_s3 }
 0x164   : > { %p903_p8 = scmp.lt.u32.totalorder %s901_s25, %s897_s4  ;;  %p905_p11 = scmp.lt.u32.totalorder %s897_s4, %s1204_s21 }
 0x165   : > { %p899_p7 = pnand %p898_p2, %p1279_p13 }
 0x166   : > { %p904_p9 = por %p903_p8, %p902_p5 }
 0x167   : > { %p900_p12 = pneg %p899_p7 }
 0x168   : > { %p906_p4 = por %p905_p11, %p904_p9 }
 0x16a   : > { %p907_p1 = pnand %p906_p4, %p900_p12 }
 0x16c   : > { %910 = shalt.err (!%p907_p1)
}
 0x16d   : > { %s980_s11 = smov 128   ;;  %s981_s5 = smov 256  }
 0x16e   : > { %s982_s10 = smov 8  }
 0x16f   : > { %721 = dma.vmem_to_hbm [thread:$0]  (%p1279_p13), %s1199_s19, 1024, %s1204_s21, %s520_s15, %s980_s11, %s981_s5, %s982_s10  }
 0x170 PF: > { %s551_s27 = sand.u32 1, %s949_s12   ;;  %p1280_p10 = scmp.ne.s32.totalorder %s1271_s24, 0 }
 0x171   : > { %p1281_p3 = scmp.ge.s32.totalorder %s969_s17, 2  ;;  %s552_s26 = scalar_lea.sflag [#allocation4], %s551_s27 }
 0x173   : > { %p732_p6 = pnand %p1281_p3, %p1280_p10 }
 0x175   : > { %944 = dma.done.wait (!%p732_p6), %s552_s26, 1024  }
 0x176   : > { %946 = vsyncadd (!%p732_p6), %s552_s26, 4294966272  ;;  %s20_s17 = sadd.s32 1, %s969_s17   ;;  %s1282_s12 = smov %s953_s13 }
 0x177   : > { %p17_p0 = scmp.ge.s32.totalorder %s20_s17, 4   ;;  %s1283_s13 = smov %s957_s14 }
 0x178   : > { %s1284_s14 = smov %s1121_s18  ;;  %s1285_s15 = smov %s965_s16 }
 0x179   : > { %s1286_s16 = smov %s1288_s30  ;;  %19 = sbr.rel (!%p17_p0) target bundleno = 7 (0x7), region = 86 }
 0x180   :  { %557 = vsyncpa [#allocation3], 1 }
 0x181   :  { %559 = vsyncpa [#allocation3 + $0x1], 1 }
 0x182   :  { %560 = vsyncpa [#allocation6], 1 }
 0x183   :  { %562 = vsyncpa [#allocation6 + $0x1], 1 }
 0x184   :  { %563 = vsyncpa [#allocation4], 1 }
 0x185   :  { %565 = vsyncpa [#allocation4 + $0x1], 1 }

</bundles_post_ra>
